<compile_context>
chip_gen: v7x
topology: tpu7x:2x2x1
jax: 0.10.0
libtpu: 0.0.40
codegen_flags: <defaults>
</compile_context>

<pallas_src>
import functools
from dataclasses import dataclass
from typing import Optional

import jax
import jax.numpy as jnp
from jax import lax
from jax.experimental import pallas as pl
from jax.experimental.pallas import tpu as pltpu


# ----------------------------- config -------------------------------------- #
@dataclass
class ITDAConfig:
    d_model: int
    target_l0: int
    loss_threshold: float
    add_error: bool = False
    subtract_mean: bool = False
    fvu_loss: bool = True
    start_size: int = 0
    error_k: Optional[int] = None
    skip_connection: bool = False
    preprocessing_steps: int = 1
    normalize: bool = False
    max_add: Optional[int] = None


@dataclass
class ITDAOutput:
    weights: jnp.ndarray
    indices: jnp.ndarray
    x_reconstructed: jnp.ndarray
    y_reconstructed: jnp.ndarray
    var_explained: jnp.ndarray
    losses: jnp.ndarray
    skip_y: Optional[jnp.ndarray] = None


EPS = 1e-3  # grad_pursuit_update_step eps


# ----------------------------- Pallas kernel ------------------------------- #
def _itda_kernel(x_ref, dict_ref, mxy_ref, w_ref, rec_ref, *,
                 target_l0: int, subtract_mean: bool, d_model: int):
    D = d_model
    x = x_ref[...]                       # [TB, D]
    xsys = dict_ref[...]                 # [F, 2D]   (xs || ys)
    xs = xsys[:, :D]                     # [F, D]    (lane slice at a 128 boundary)
    mxy = mxy_ref[...]                   # [1, 2D]   (mean_x || mean_y)
    mx = mxy[:, :D]

    xc = x - mx if subtract_mean else x

    TB, F = w_ref.shape

    # ---- one-time D-wide matmuls (Gram reformulation) ---------------------- #
    # G[f,g] = <xs_f, xs_g>, p[b,f] = <xc_b, xs_f>
    G = lax.dot_general(xs, xs, (((1,), (1,)), ((), ())),
                        preferred_element_type=jnp.float32)        # [F, F]
    p = lax.dot_general(xc, xs, (((1,), (1,)), ((), ())),
                        preferred_element_type=jnp.float32)        # [TB, F]

    col = lax.broadcasted_iota(jnp.int32, (TB, F), 1)
    w = jnp.zeros((TB, F), jnp.float32)

    # grad_pursuit: target_l0 update steps (statically unrolled; target_l0 tiny).
    # Per-iteration work is now only [TB,F]@[F,F] matmuls + F-wide reductions.
    for _ in range(target_l0):
        # inner_products = residual @ xs^T == p - w @ G
        ip = p - jnp.dot(w, G, preferred_element_type=jnp.float32)  # [TB, F]
        sel = w != 0
        # argmax over features (first max index, like torch.argmax)
        ip_max = jnp.max(ip, axis=1, keepdims=True)
        idx = jnp.min(jnp.where(ip == ip_max, col, F), axis=1, keepdims=True)
        sel = jnp.logical_or(sel, col == idx)
        grad = jnp.where(sel, ip, 0.0)                               # [TB, F]
        gG = jnp.dot(grad, G, preferred_element_type=jnp.float32)    # [TB, F]
        c_sq = jnp.sum(grad * gG, axis=1, keepdims=True)   # == |grad @ xs|^2
        num = jnp.sum(grad * ip, axis=1, keepdims=True)    # == <grad @ xs, residual>
        step = num / jnp.maximum(c_sq, EPS)
        w = jnp.maximum(w + step * grad, 0.0)                        # relu

    w_ref[...] = w

    # Fused decode: one [TB,F]@[F,2D] matmul produces xr||yr (lane-dense output).
    rec = jnp.dot(w, xsys, preferred_element_type=jnp.float32)       # [TB, 2D]
    if subtract_mean:
        rec = rec + mxy
    rec_ref[...] = rec


def _batch_tile(B: int) -> int:
    """Largest batch tile <= 256 that divides B (multiple of 8 when tiling)."""
    if B <= 256:
        return B
    for t in range(256, 7, -8):
        if B % t == 0:
            return t
    return B  # fall back to a single block


def _run_itda_pallas(x, dict_cat, mxy, *, target_l0, subtract_mean):
    B, D = x.shape
    F, D2 = dict_cat.shape
    tile_b = _batch_tile(B)
    grid = (B // tile_b,)

    kernel = functools.partial(_itda_kernel, target_l0=target_l0,
                               subtract_mean=subtract_mean, d_model=D)

    w_full, rec = pl.pallas_call(
        kernel,
        out_shape=(
            jax.ShapeDtypeStruct((B, F), jnp.float32),    # dense pursuit weights
            jax.ShapeDtypeStruct((B, D2), jnp.float32),   # [x_rec || y_rec]
        ),
        grid=grid,
        in_specs=[
            pl.BlockSpec((tile_b, D), lambda i: (i, 0)),   # x (batch-tiled)
            pl.BlockSpec((F, D2), lambda i: (0, 0)),       # xs||ys (constant)
            pl.BlockSpec((1, D2), lambda i: (0, 0)),       # means (constant)
        ],
        out_specs=(
            pl.BlockSpec((tile_b, F), lambda i: (i, 0)),
            pl.BlockSpec((tile_b, D2), lambda i: (i, 0)),
        ),
        compiler_params=pltpu.CompilerParams(
            dimension_semantics=("parallel",),          # batch axis -> both TCs on v7x
            vmem_limit_bytes=32 * 1024 * 1024),
    )(x, dict_cat, mxy)
    return w_full, rec


# ----------------------------- ITDA forward wrapper ------------------------ #
def itda_forward(params, config: ITDAConfig, x, y, target_l0=None):
    x = x.astype(jnp.float32)
    y = y.astype(jnp.float32)
    xs, ys = params["xs"].astype(jnp.float32), params["ys"].astype(jnp.float32)
    mean_x = params["mean_x"].reshape(1, -1).astype(jnp.float32)
    mean_y = params["mean_y"].reshape(1, -1).astype(jnp.float32)
    dictionary_size = xs.shape[0]
    D = x.shape[1]

    if target_l0 is None:
        target_l0 = config.target_l0
    target_l0 = min(target_l0, dictionary_size)

    # TODO(synk): skip_connection / dictionary_size==0 / add_error branches are
    # config-dependent control flow not exercised here (skip_connection=False).
    dict_cat = jnp.concatenate([xs, ys], axis=1)          # [F, 2D]
    mxy = jnp.concatenate([mean_x, mean_y], axis=1)       # [1, 2D]

    w_full, rec = _run_itda_pallas(x, dict_cat, mxy, target_l0=target_l0,
                                   subtract_mean=config.subtract_mean)
    x_rec = rec[:, :D]
    y_rec = rec[:, D:]

    # topk over the dense weights -> (weights, indices), like grad_pursuit's return
    weights_k, indices_k = lax.top_k(w_full, target_l0)

    # losses (computed from the returned reconstruction; no sub-lane kernel outputs)
    l2 = jnp.sum(jnp.square(y - y_rec), axis=-1)
    if config.fvu_loss:
        total_variance = jnp.mean(jnp.sum(jnp.square(y - mean_y), axis=-1))
        losses = l2 / total_variance
    else:
        losses = l2

    # var_explained (small batch statistics, plain JAX glue)
    yc = y - jnp.mean(y, axis=0)
    yrc = y_rec - jnp.mean(y_rec, axis=0)
    correlation = jnp.mean(yc * yrc, axis=0)
    var_y = jnp.var(y, axis=0, ddof=1)          # torch.var default: unbiased
    var_yr = jnp.var(y_rec, axis=0, ddof=1)
    var_explained = jnp.mean(
        jnp.nan_to_num(jnp.square(correlation) / (var_y * var_yr)))

    return ITDAOutput(weights=weights_k, indices=indices_k,
                      x_reconstructed=x_rec, y_reconstructed=y_rec,
                      var_explained=var_explained, losses=losses, skip_y=None)


# ----------------------------- pure-JAX reference -------------------------- #
def _ref_forward(params, config, x, y):
    xs, ys = params["xs"], params["ys"]
    mx, my = params["mean_x"], params["mean_y"]
    xc = x - mx if config.subtract_mean else x
    B, D = x.shape
    F = xs.shape[0]
    w = jnp.zeros((B, F), jnp.float32)
    for _ in range(config.target_l0):
        residual = xc - w @ xs
        ip = residual @ xs.T
        sel = w != 0
        idx = jnp.argmax(ip, axis=1)
        sel = sel.at[jnp.arange(B), idx].set(True)
        grad = jnp.where(sel, ip, 0.0)
        c = grad @ xs
        c_sq = jnp.sum(c * c, -1)
        step = jnp.sum(c * residual, -1) / jnp.maximum(c_sq, EPS)
        w = jax.nn.relu(w + step[:, None] * grad)
    xr = w @ xs + (mx if config.subtract_mean else 0.0)
    yr = w @ ys + (my if config.subtract_mean else 0.0)
    l2 = jnp.sum((y - yr) ** 2, -1)
    tv = jnp.mean(jnp.sum((y - my) ** 2, -1))
    return w, xr, yr, l2 / tv


# ----------------------------- main ----------------------------------------- #
if __name__ == "__main__":
    B, D, F = 8, 128, 16          # batch, d_model, dictionary_size
    config = ITDAConfig(d_model=D, target_l0=4, loss_threshold=0.1,
                        subtract_mean=True, fvu_loss=True)

    key = jax.random.PRNGKey(0)
    kx, ky, kxs, kys, kmx, kmy = jax.random.split(key, 6)
    x = jax.random.normal(kx, (B, D), jnp.float32)
    y = jax.random.normal(ky, (B, D), jnp.float32)

    # deterministic synthetic dictionary (unit-norm atoms, as ITDA.step would store)
    xs = jax.random.normal(kxs, (F, D), jnp.float32)
    xs = xs / jnp.linalg.norm(xs, axis=-1, keepdims=True)
    ys = jax.random.normal(kys, (F, D), jnp.float32)
    ys = ys / jnp.linalg.norm(ys, axis=-1, keepdims=True)
    mean_x = 0.05 * jax.random.normal(kmx, (D,), jnp.float32)
    mean_y = 0.05 * jax.random.normal(kmy, (D,), jnp.float32)

    params = {"xs": xs, "ys": ys, "mean_x": mean_x, "mean_y": mean_y}

    out = itda_forward(params, config, x, y)
    jax.block_until_ready(out.y_reconstructed)

    # correctness check against a pure-JAX reference
    _, xr_ref, yr_ref, losses_ref = _ref_forward(params, config, x, y)
    assert jnp.allclose(out.x_reconstructed, xr_ref, atol=1e-4, rtol=1e-4)
    assert jnp.allclose(out.y_reconstructed, yr_ref, atol=1e-4, rtol=1e-4)
    assert jnp.allclose(out.losses, losses_ref, atol=1e-4, rtol=1e-4)
    assert out.weights.shape == (B, config.target_l0)
    assert out.indices.shape == (B, config.target_l0)

    print("KERNEL_OK")
</pallas_src>

<mosaic_0001>
module attributes {stable_mosaic.version = 11 : i64} {
  func.func @_itda_kernel(%arg0: i32, %arg1: memref<8x128xf32, #tpu.memory_space<vmem>>, %arg2: memref<16x256xf32, #tpu.memory_space<vmem>>, %arg3: memref<1x256xf32, #tpu.memory_space<vmem>>, %arg4: memref<8x16xf32, #tpu.memory_space<vmem>>, %arg5: memref<8x256xf32, #tpu.memory_space<vmem>>) attributes {dimension_semantics = [#tpu.dimension_semantics<parallel>], iteration_bounds = array<i64: 1>, scalar_prefetch = 0 : i64, scratch_operands = 0 : i64, tpu.core_type = #tpu.core_type<tc>, window_params = [{transform_indices = @transform_0, window_bounds = array<i64: 8, 128>}, {pipeline_mode = #tpu.pipeline_mode<synchronous>, transform_indices = @transform_1, window_bounds = array<i64: 16, 256>}, {pipeline_mode = #tpu.pipeline_mode<synchronous>, transform_indices = @transform_2, window_bounds = array<i64: 1, 256>}, {transform_indices = @transform_3, window_bounds = array<i64: 8, 16>}, {transform_indices = @transform_4, window_bounds = array<i64: 8, 256>}]} {
    %c0 = arith.constant 0 : index
    %c0_0 = arith.constant 0 : index
    %0 = vector.load %arg1[%c0, %c0_0] : memref<8x128xf32, #tpu.memory_space<vmem>>, vector<8x128xf32>
    %c0_1 = arith.constant 0 : index
    %c0_2 = arith.constant 0 : index
    %1 = vector.load %arg2[%c0_1, %c0_2] : memref<16x256xf32, #tpu.memory_space<vmem>>, vector<16x256xf32>
    %2 = vector.extract_strided_slice %1 {offsets = [0, 0], sizes = [16, 128], strides = [1, 1]} : vector<16x256xf32> to vector<16x128xf32>
    %c0_3 = arith.constant 0 : index
    %c0_4 = arith.constant 0 : index
    %3 = vector.load %arg3[%c0_3, %c0_4] : memref<1x256xf32, #tpu.memory_space<vmem>>, vector<1x256xf32>
    %4 = vector.extract_strided_slice %3 {offsets = [0, 0], sizes = [1, 128], strides = [1, 1]} : vector<1x256xf32> to vector<1x128xf32>
    %5 = vector.broadcast %4 : vector<1x128xf32> to vector<8x128xf32>
    %6 = arith.subf %0, %5 : vector<8x128xf32>
    %cst = arith.constant dense<0.000000e+00> : vector<16x16xf32>
    %7 = tpu.matmul %2, %2, %cst {dimension_numbers = #tpu.dot_dimension_numbers<[1], [1], [0], [0], [0, 0, 1, 0], [], []>} : vector<16x128xf32>, vector<16x128xf32>, vector<16x16xf32> -> vector<16x16xf32>
    %cst_5 = arith.constant dense<0.000000e+00> : vector<8x16xf32>
    %8 = tpu.matmul %6, %2, %cst_5 {dimension_numbers = #tpu.dot_dimension_numbers<[1], [1], [0], [0], [0, 0, 1, 0], [], []>} : vector<8x128xf32>, vector<16x128xf32>, vector<8x16xf32> -> vector<8x16xf32>
    %9 = tpu.iota {dimensions = array<i32: 1>} : vector<8x16xi32>
    %cst_6 = arith.constant 0.000000e+00 : f32
    %10 = vector.broadcast %cst_6 : f32 to vector<8x16xf32>
    %cst_7 = arith.constant dense<0.000000e+00> : vector<8x16xf32>
    %11 = tpu.matmul %10, %7, %cst_7 {dimension_numbers = #tpu.dot_dimension_numbers<[1], [0], [0], [1], [0, 0, 1, 1], [], []>} : vector<8x16xf32>, vector<16x16xf32>, vector<8x16xf32> -> vector<8x16xf32>
    %12 = arith.subf %8, %11 : vector<8x16xf32>
    %cst_8 = arith.constant 0.000000e+00 : f32
    %13 = vector.broadcast %cst_8 : f32 to vector<8x16xf32>
    %14 = arith.cmpf one, %10, %13 : vector<8x16xf32>
    %cst_9 = arith.constant dense<0xFF800000> : vector<8xf32>
    %15 = vector.multi_reduction <maximumf>, %12, %cst_9 [1] : vector<8x16xf32> to vector<8xf32>
    %16 = vector.shape_cast %15 : vector<8xf32> to vector<8x1xf32>
    %17 = vector.broadcast %16 : vector<8x1xf32> to vector<8x16xf32>
    %18 = arith.cmpf oeq, %12, %17 : vector<8x16xf32>
    %c16_i32 = arith.constant 16 : i32
    %19 = vector.broadcast %c16_i32 : i32 to vector<8x16xi32>
    %20 = arith.select %18, %9, %19 : vector<8x16xi1>, vector<8x16xi32>
    %cst_10 = arith.constant dense<2147483647> : vector<8xi32>
    %21 = vector.multi_reduction <minsi>, %20, %cst_10 [1] : vector<8x16xi32> to vector<8xi32>
    %22 = vector.shape_cast %21 : vector<8xi32> to vector<8x1xi32>
    %23 = vector.broadcast %22 : vector<8x1xi32> to vector<8x16xi32>
    %24 = arith.cmpi eq, %9, %23 : vector<8x16xi32>
    %25 = arith.ori %14, %24 : vector<8x16xi1>
    %cst_11 = arith.constant 0.000000e+00 : f32
    %26 = vector.broadcast %cst_11 : f32 to vector<8x16xf32>
    %27 = arith.select %25, %12, %26 : vector<8x16xi1>, vector<8x16xf32>
    %cst_12 = arith.constant dense<0.000000e+00> : vector<8x16xf32>
    %28 = tpu.matmul %27, %7, %cst_12 {dimension_numbers = #tpu.dot_dimension_numbers<[1], [0], [0], [1], [0, 0, 1, 1], [], []>} : vector<8x16xf32>, vector<16x16xf32>, vector<8x16xf32> -> vector<8x16xf32>
    %29 = arith.mulf %27, %28 : vector<8x16xf32>
    %cst_13 = arith.constant dense<0.000000e+00> : vector<8xf32>
    %30 = vector.multi_reduction <add>, %29, %cst_13 [1] : vector<8x16xf32> to vector<8xf32>
    %31 = vector.shape_cast %30 : vector<8xf32> to vector<8x1xf32>
    %32 = arith.mulf %27, %12 : vector<8x16xf32>
    %cst_14 = arith.constant dense<0.000000e+00> : vector<8xf32>
    %33 = vector.multi_reduction <add>, %32, %cst_14 [1] : vector<8x16xf32> to vector<8xf32>
    %34 = vector.shape_cast %33 : vector<8xf32> to vector<8x1xf32>
    %cst_15 = arith.constant 1.000000e-03 : f32
    %35 = vector.broadcast %cst_15 : f32 to vector<8x1xf32>
    %36 = arith.maximumf %31, %35 : vector<8x1xf32>
    %37 = arith.divf %34, %36 : vector<8x1xf32>
    %38 = vector.broadcast %37 : vector<8x1xf32> to vector<8x16xf32>
    %39 = arith.mulf %38, %27 : vector<8x16xf32>
    %40 = arith.addf %10, %39 : vector<8x16xf32>
    %cst_16 = arith.constant 0.000000e+00 : f32
    %41 = vector.broadcast %cst_16 : f32 to vector<8x16xf32>
    %42 = arith.maximumf %40, %41 : vector<8x16xf32>
    %cst_17 = arith.constant dense<0.000000e+00> : vector<8x16xf32>
    %43 = tpu.matmul %42, %7, %cst_17 {dimension_numbers = #tpu.dot_dimension_numbers<[1], [0], [0], [1], [0, 0, 1, 1], [], []>} : vector<8x16xf32>, vector<16x16xf32>, vector<8x16xf32> -> vector<8x16xf32>
    %44 = arith.subf %8, %43 : vector<8x16xf32>
    %cst_18 = arith.constant 0.000000e+00 : f32
    %45 = vector.broadcast %cst_18 : f32 to vector<8x16xf32>
    %46 = arith.cmpf one, %42, %45 : vector<8x16xf32>
    %cst_19 = arith.constant dense<0xFF800000> : vector<8xf32>
    %47 = vector.multi_reduction <maximumf>, %44, %cst_19 [1] : vector<8x16xf32> to vector<8xf32>
    %48 = vector.shape_cast %47 : vector<8xf32> to vector<8x1xf32>
    %49 = vector.broadcast %48 : vector<8x1xf32> to vector<8x16xf32>
    %50 = arith.cmpf oeq, %44, %49 : vector<8x16xf32>
    %c16_i32_20 = arith.constant 16 : i32
    %51 = vector.broadcast %c16_i32_20 : i32 to vector<8x16xi32>
    %52 = arith.select %50, %9, %51 : vector<8x16xi1>, vector<8x16xi32>
    %cst_21 = arith.constant dense<2147483647> : vector<8xi32>
    %53 = vector.multi_reduction <minsi>, %52, %cst_21 [1] : vector<8x16xi32> to vector<8xi32>
    %54 = vector.shape_cast %53 : vector<8xi32> to vector<8x1xi32>
    %55 = vector.broadcast %54 : vector<8x1xi32> to vector<8x16xi32>
    %56 = arith.cmpi eq, %9, %55 : vector<8x16xi32>
    %57 = arith.ori %46, %56 : vector<8x16xi1>
    %cst_22 = arith.constant 0.000000e+00 : f32
    %58 = vector.broadcast %cst_22 : f32 to vector<8x16xf32>
    %59 = arith.select %57, %44, %58 : vector<8x16xi1>, vector<8x16xf32>
    %cst_23 = arith.constant dense<0.000000e+00> : vector<8x16xf32>
    %60 = tpu.matmul %59, %7, %cst_23 {dimension_numbers = #tpu.dot_dimension_numbers<[1], [0], [0], [1], [0, 0, 1, 1], [], []>} : vector<8x16xf32>, vector<16x16xf32>, vector<8x16xf32> -> vector<8x16xf32>
    %61 = arith.mulf %59, %60 : vector<8x16xf32>
    %cst_24 = arith.constant dense<0.000000e+00> : vector<8xf32>
    %62 = vector.multi_reduction <add>, %61, %cst_24 [1] : vector<8x16xf32> to vector<8xf32>
    %63 = vector.shape_cast %62 : vector<8xf32> to vector<8x1xf32>
    %64 = arith.mulf %59, %44 : vector<8x16xf32>
    %cst_25 = arith.constant dense<0.000000e+00> : vector<8xf32>
    %65 = vector.multi_reduction <add>, %64, %cst_25 [1] : vector<8x16xf32> to vector<8xf32>
    %66 = vector.shape_cast %65 : vector<8xf32> to vector<8x1xf32>
    %cst_26 = arith.constant 1.000000e-03 : f32
    %67 = vector.broadcast %cst_26 : f32 to vector<8x1xf32>
    %68 = arith.maximumf %63, %67 : vector<8x1xf32>
    %69 = arith.divf %66, %68 : vector<8x1xf32>
    %70 = vector.broadcast %69 : vector<8x1xf32> to vector<8x16xf32>
    %71 = arith.mulf %70, %59 : vector<8x16xf32>
    %72 = arith.addf %42, %71 : vector<8x16xf32>
    %cst_27 = arith.constant 0.000000e+00 : f32
    %73 = vector.broadcast %cst_27 : f32 to vector<8x16xf32>
    %74 = arith.maximumf %72, %73 : vector<8x16xf32>
    %cst_28 = arith.constant dense<0.000000e+00> : vector<8x16xf32>
    %75 = tpu.matmul %74, %7, %cst_28 {dimension_numbers = #tpu.dot_dimension_numbers<[1], [0], [0], [1], [0, 0, 1, 1], [], []>} : vector<8x16xf32>, vector<16x16xf32>, vector<8x16xf32> -> vector<8x16xf32>
    %76 = arith.subf %8, %75 : vector<8x16xf32>
    %cst_29 = arith.constant 0.000000e+00 : f32
    %77 = vector.broadcast %cst_29 : f32 to vector<8x16xf32>
    %78 = arith.cmpf one, %74, %77 : vector<8x16xf32>
    %cst_30 = arith.constant dense<0xFF800000> : vector<8xf32>
    %79 = vector.multi_reduction <maximumf>, %76, %cst_30 [1] : vector<8x16xf32> to vector<8xf32>
    %80 = vector.shape_cast %79 : vector<8xf32> to vector<8x1xf32>
    %81 = vector.broadcast %80 : vector<8x1xf32> to vector<8x16xf32>
    %82 = arith.cmpf oeq, %76, %81 : vector<8x16xf32>
    %c16_i32_31 = arith.constant 16 : i32
    %83 = vector.broadcast %c16_i32_31 : i32 to vector<8x16xi32>
    %84 = arith.select %82, %9, %83 : vector<8x16xi1>, vector<8x16xi32>
    %cst_32 = arith.constant dense<2147483647> : vector<8xi32>
    %85 = vector.multi_reduction <minsi>, %84, %cst_32 [1] : vector<8x16xi32> to vector<8xi32>
    %86 = vector.shape_cast %85 : vector<8xi32> to vector<8x1xi32>
    %87 = vector.broadcast %86 : vector<8x1xi32> to vector<8x16xi32>
    %88 = arith.cmpi eq, %9, %87 : vector<8x16xi32>
    %89 = arith.ori %78, %88 : vector<8x16xi1>
    %cst_33 = arith.constant 0.000000e+00 : f32
    %90 = vector.broadcast %cst_33 : f32 to vector<8x16xf32>
    %91 = arith.select %89, %76, %90 : vector<8x16xi1>, vector<8x16xf32>
    %cst_34 = arith.constant dense<0.000000e+00> : vector<8x16xf32>
    %92 = tpu.matmul %91, %7, %cst_34 {dimension_numbers = #tpu.dot_dimension_numbers<[1], [0], [0], [1], [0, 0, 1, 1], [], []>} : vector<8x16xf32>, vector<16x16xf32>, vector<8x16xf32> -> vector<8x16xf32>
    %93 = arith.mulf %91, %92 : vector<8x16xf32>
    %cst_35 = arith.constant dense<0.000000e+00> : vector<8xf32>
    %94 = vector.multi_reduction <add>, %93, %cst_35 [1] : vector<8x16xf32> to vector<8xf32>
    %95 = vector.shape_cast %94 : vector<8xf32> to vector<8x1xf32>
    %96 = arith.mulf %91, %76 : vector<8x16xf32>
    %cst_36 = arith.constant dense<0.000000e+00> : vector<8xf32>
    %97 = vector.multi_reduction <add>, %96, %cst_36 [1] : vector<8x16xf32> to vector<8xf32>
    %98 = vector.shape_cast %97 : vector<8xf32> to vector<8x1xf32>
    %cst_37 = arith.constant 1.000000e-03 : f32
    %99 = vector.broadcast %cst_37 : f32 to vector<8x1xf32>
    %100 = arith.maximumf %95, %99 : vector<8x1xf32>
    %101 = arith.divf %98, %100 : vector<8x1xf32>
    %102 = vector.broadcast %101 : vector<8x1xf32> to vector<8x16xf32>
    %103 = arith.mulf %102, %91 : vector<8x16xf32>
    %104 = arith.addf %74, %103 : vector<8x16xf32>
    %cst_38 = arith.constant 0.000000e+00 : f32
    %105 = vector.broadcast %cst_38 : f32 to vector<8x16xf32>
    %106 = arith.maximumf %104, %105 : vector<8x16xf32>
    %cst_39 = arith.constant dense<0.000000e+00> : vector<8x16xf32>
    %107 = tpu.matmul %106, %7, %cst_39 {dimension_numbers = #tpu.dot_dimension_numbers<[1], [0], [0], [1], [0, 0, 1, 1], [], []>} : vector<8x16xf32>, vector<16x16xf32>, vector<8x16xf32> -> vector<8x16xf32>
    %108 = arith.subf %8, %107 : vector<8x16xf32>
    %cst_40 = arith.constant 0.000000e+00 : f32
    %109 = vector.broadcast %cst_40 : f32 to vector<8x16xf32>
    %110 = arith.cmpf one, %106, %109 : vector<8x16xf32>
    %cst_41 = arith.constant dense<0xFF800000> : vector<8xf32>
    %111 = vector.multi_reduction <maximumf>, %108, %cst_41 [1] : vector<8x16xf32> to vector<8xf32>
    %112 = vector.shape_cast %111 : vector<8xf32> to vector<8x1xf32>
    %113 = vector.broadcast %112 : vector<8x1xf32> to vector<8x16xf32>
    %114 = arith.cmpf oeq, %108, %113 : vector<8x16xf32>
    %c16_i32_42 = arith.constant 16 : i32
    %115 = vector.broadcast %c16_i32_42 : i32 to vector<8x16xi32>
    %116 = arith.select %114, %9, %115 : vector<8x16xi1>, vector<8x16xi32>
    %cst_43 = arith.constant dense<2147483647> : vector<8xi32>
    %117 = vector.multi_reduction <minsi>, %116, %cst_43 [1] : vector<8x16xi32> to vector<8xi32>
    %118 = vector.shape_cast %117 : vector<8xi32> to vector<8x1xi32>
    %119 = vector.broadcast %118 : vector<8x1xi32> to vector<8x16xi32>
    %120 = arith.cmpi eq, %9, %119 : vector<8x16xi32>
    %121 = arith.ori %110, %120 : vector<8x16xi1>
    %cst_44 = arith.constant 0.000000e+00 : f32
    %122 = vector.broadcast %cst_44 : f32 to vector<8x16xf32>
    %123 = arith.select %121, %108, %122 : vector<8x16xi1>, vector<8x16xf32>
    %cst_45 = arith.constant dense<0.000000e+00> : vector<8x16xf32>
    %124 = tpu.matmul %123, %7, %cst_45 {dimension_numbers = #tpu.dot_dimension_numbers<[1], [0], [0], [1], [0, 0, 1, 1], [], []>} : vector<8x16xf32>, vector<16x16xf32>, vector<8x16xf32> -> vector<8x16xf32>
    %125 = arith.mulf %123, %124 : vector<8x16xf32>
    %cst_46 = arith.constant dense<0.000000e+00> : vector<8xf32>
    %126 = vector.multi_reduction <add>, %125, %cst_46 [1] : vector<8x16xf32> to vector<8xf32>
    %127 = vector.shape_cast %126 : vector<8xf32> to vector<8x1xf32>
    %128 = arith.mulf %123, %108 : vector<8x16xf32>
    %cst_47 = arith.constant dense<0.000000e+00> : vector<8xf32>
    %129 = vector.multi_reduction <add>, %128, %cst_47 [1] : vector<8x16xf32> to vector<8xf32>
    %130 = vector.shape_cast %129 : vector<8xf32> to vector<8x1xf32>
    %cst_48 = arith.constant 1.000000e-03 : f32
    %131 = vector.broadcast %cst_48 : f32 to vector<8x1xf32>
    %132 = arith.maximumf %127, %131 : vector<8x1xf32>
    %133 = arith.divf %130, %132 : vector<8x1xf32>
    %134 = vector.broadcast %133 : vector<8x1xf32> to vector<8x16xf32>
    %135 = arith.mulf %134, %123 : vector<8x16xf32>
    %136 = arith.addf %106, %135 : vector<8x16xf32>
    %cst_49 = arith.constant 0.000000e+00 : f32
    %137 = vector.broadcast %cst_49 : f32 to vector<8x16xf32>
    %138 = arith.maximumf %136, %137 : vector<8x16xf32>
    %c0_50 = arith.constant 0 : index
    %c0_51 = arith.constant 0 : index
    %139 = vector.load %arg4[%c0_50, %c0_51] : memref<8x16xf32, #tpu.memory_space<vmem>>, vector<8x16xf32>
    tpu.vector_store %arg4[%c0_50, %c0_51], %138 {strides = array<i32>} : memref<8x16xf32, #tpu.memory_space<vmem>>, vector<8x16xf32>,
    %cst_52 = arith.constant dense<0.000000e+00> : vector<8x256xf32>
    %140 = tpu.matmul %138, %1, %cst_52 {dimension_numbers = #tpu.dot_dimension_numbers<[1], [0], [0], [1], [0, 0, 1, 1], [], []>} : vector<8x16xf32>, vector<16x256xf32>, vector<8x256xf32> -> vector<8x256xf32>
    %141 = vector.broadcast %3 : vector<1x256xf32> to vector<8x256xf32>
    %142 = arith.addf %140, %141 : vector<8x256xf32>
    %c0_53 = arith.constant 0 : index
    %c0_54 = arith.constant 0 : index
    %143 = vector.load %arg5[%c0_53, %c0_54] : memref<8x256xf32, #tpu.memory_space<vmem>>, vector<8x256xf32>
    tpu.vector_store %arg5[%c0_53, %c0_54], %142 {strides = array<i32>} : memref<8x256xf32, #tpu.memory_space<vmem>>, vector<8x256xf32>,
    return
  }
  func.func @transform_0(%arg0: i32) -> (i32, i32) {
    %c0_i32 = arith.constant 0 : i32
    %c0_i32_0 = arith.constant 0 : i32
    return %arg0, %c0_i32 : i32, i32
  }
  func.func @transform_1(%arg0: i32) -> (i32, i32) {
    %c0_i32 = arith.constant 0 : i32
    %c0_i32_0 = arith.constant 0 : i32
    %c0_i32_1 = arith.constant 0 : i32
    return %c0_i32, %c0_i32_0 : i32, i32
  }
  func.func @transform_2(%arg0: i32) -> (i32, i32) {
    %c0_i32 = arith.constant 0 : i32
    %c0_i32_0 = arith.constant 0 : i32
    %c0_i32_1 = arith.constant 0 : i32
    return %c0_i32, %c0_i32_0 : i32, i32
  }
  func.func @transform_3(%arg0: i32) -> (i32, i32) {
    %c0_i32 = arith.constant 0 : i32
    %c0_i32_0 = arith.constant 0 : i32
    return %arg0, %c0_i32 : i32, i32
  }
  func.func @transform_4(%arg0: i32) -> (i32, i32) {
    %c0_i32 = arith.constant 0 : i32
    %c0_i32_0 = arith.constant 0 : i32
    return %arg0, %c0_i32 : i32, i32
  }
}

</mosaic_0001>

<bundles_post_ra>
// kernel: tpu_custom_call.1
= control target key start
LH: loop header
LB: loop body
LE: loop exit
PB: predicated region body
PF: predicated region fallthrough
CT: control target
= control target key end

     0   :  { %10 = vsyncpa [#allocation3], 0  ;;  %s1504_s0 = inlined_call_operand.hbm [shape: f32[8,128], index: 0, kind: input, shape index: {}]   ;;  %s1505_s1 = inlined_call_operand.hbm [shape: f32[16,256], index: 1, kind: input, shape index: {}]   ;;  %s1506_s2 = inlined_call_operand.vmem [shape: f32[1,256], index: 2, kind: input, shape index: {}]   ;;  %s1507_s3 = inlined_call_operand.hbm [shape: f32[8,16], index: 3, kind: output, shape index: {0}]   ;;  %s1508_s4 = inlined_call_operand.hbm [shape: f32[8,256], index: 4, kind: output, shape index: {1}]  }
   0x1   :  { %11 = vsyncpa [#allocation6], 0 }
   0x2   :  { %12 = vsyncpa [#allocation4], 0 }
   0x3   :  { %13 = vsyncpa [#allocation9], 0  ;;  %s1314_s15 = smov [#allocation2]   ;;  %s1315_s17 = smov [#allocation5]  }
   0x4   :  { %s20_s16 = sshll.u32 %s1314_s15, 4  ;;  %s29_s18 = sshll.u32 %s1315_s17, 4  ;;  %s21_s16 = int_to_ptr.vmem [resolvable:$true] %s20_s16  ;;  %s1348_s18 = int_to_ptr.vmem [resolvable:$true] %s29_s18 }
   0x5   :  { %s1218_s21 = scalar_lea.hbm %s1504_s0, 128 }
   0x6   :  { %p1219_p0 = scmp.ne.s32.totalorder %s1504_s0, %s1218_s21  ;;  %p1222_p1 = scmp.lt.u32.totalorder %s1218_s21, %s1504_s0 }
   0x8   :  { %p1224_p2 = pnand %p1222_p1, %p1219_p0 }
   0xa   :  { %1227 = shalt.err (!%p1224_p2)
}
   0xb   :  { %s1228_s26 = scalar_lea.vmem %s21_s16, 128  ;;  %p1233_p4 = scmp.lt.s32.totalorder %s21_s16, %s21_s16 }
   0xc   :  { %p1229_p3 = scmp.ne.s32.totalorder %s21_s16, %s1228_s26  ;;  %p1234_p5 = scmp.lt.s32.totalorder %s1228_s26, %s1228_s26 }
   0xe   :  { %p1235_p6 = por %p1234_p5, %p1233_p4 }
  0x10   :  { %p1236_p7 = pnand %p1235_p6, %p1229_p3 }
  0x12   :  { %1239 = shalt.err (!%p1236_p7)
}
  0x13   :  { %23 = dma.hbm_to_vmem [thread:$0]  %s1504_s0, 128, %s21_s16, [#allocation3]  }
  0x14   :  { %s1240_s5 = scalar_lea.hbm %s1505_s1, 512 }
  0x15   :  { %p1241_p8 = scmp.ne.s32.totalorder %s1505_s1, %s1240_s5  ;;  %p1244_p9 = scmp.lt.u32.totalorder %s1240_s5, %s1505_s1 }
  0x17   :  { %p1246_p10 = pnand %p1244_p9, %p1241_p8 }
  0x19   :  { %1249 = shalt.err (!%p1246_p10)
}
  0x1a   :  { %s1250_s10 = scalar_lea.vmem %s1348_s18, 512  ;;  %p1255_p12 = scmp.lt.s32.totalorder %s1348_s18, %s1348_s18 }
  0x1b   :  { %p1251_p11 = scmp.ne.s32.totalorder %s1348_s18, %s1250_s10  ;;  %p1256_p13 = scmp.lt.s32.totalorder %s1250_s10, %s1250_s10 }
  0x1d   :  { %p1257_p0 = por %p1256_p13, %p1255_p12 }
  0x1f   :  { %p1258_p1 = pnand %p1257_p0, %p1251_p11 }
  0x21   :  { %1261 = shalt.err (!%p1258_p1)
}
  0x22   :  { %s1316_s0 = smov 256   ;;  %s1317_s11 = smov 16  }
  0x23   :  { %35 = dma.hbm_to_vmem [thread:$0]  %s1505_s1, 512, %s1348_s18, [#allocation6], %s1316_s0, %s1316_s0, %s1317_s11  }
  0x24   :  { %1306 = dma.done.wait [#allocation3], 128  }
  0x25   :  { %1307 = vsyncadd [#allocation3], 4294967168 }
  0x26   :  { %1308 = dma.done.wait [#allocation6], 512  }
  0x27   :  { %1309 = vsyncadd [#allocation6], 4294966784  ;;  %v1318_v0 = vmov 0.0|0.0   ;;  %v45_v1 = vld [vmem:[#allocation5] sm:$0xff]  ;;  %v47_v2 = vld [vmem:[#allocation5 + $0x10] sm:$0xff]  ;;  %v51_v4 = vlaneseq  ;;  %vm1319_vm0 = vmmov 0  }
  0x28   :  { %1170 = vmatprep.subr.bf16.mxu1 %v1318_v0  ;;  %v1380_v3 = vpack.c.bf16 %v47_v2, %v45_v1  ;;  %1100 = vmatprep.mubr.f32.mxu0 %v45_v1  ;;  %v1393_v7 = vld [vmem:[%s1506_s2] sm:$0x3]  ;;  %v1320_v11 = vmov 0.0   ;;  %vm204_vm1 = vcmask 130048   ;;  %s1321_s2 = smov [#allocation7]  }
  0x29   :  { %v1387_v5 = vshrl.u32 %v51_v4, 7  ;;  %v44_v9 = vld [vmem:[#allocation2] sm:$0xff]  ;;  %1107 = vmatprep.mubr.msk.f32.mxu1 %vm1319_vm0, %v1320_v11  ;;  %v1420_v21 = vand.u32 127, %v51_v4  ;;  %s1033_s15 = sshll.u32 %s1321_s2, 4  ;;  %s1034_s15 = int_to_ptr.vmem [resolvable:$true] %s1033_s15 }
  0x2a   :  { %1167 = vmatprep.subr.bf16.mxu0 %v1380_v3  ;;  %1172 = vmatpush3.bf16.xpose.msra.mxu1 %v1380_v3  ;;  %s1262_s16 = scalar_lea.vmem %s1034_s15, 128  ;;  %p1267_p3 = scmp.lt.s32.totalorder %s1034_s15, %s1034_s15 }
  0x2b   :  { %1169 = vmatpush3.bf16.xpose.msra.mxu0 %v1380_v3  ;;  %1176 = vmatprep.subr.bf16.mxu1 %v1318_v0  ;;  %v53_v6 = vsub.s32 0, %v1387_v5  ;;  %p1263_p2 = scmp.ne.s32.totalorder %s1034_s15, %s1262_s16  ;;  %p1268_p4 = scmp.lt.s32.totalorder %s1262_s16, %s1262_s16 }
  0x2c   :  { %1173 = vmatprep.subr.bf16.mxu0 %v1318_v0 }
  0x2d   :  { %v1396_v8 = vrot.slane %v1393_v7, %v53_v6  ;;  %p1269_p5 = por %p1268_p4, %p1267_p3 }
  0x2f   :  { %v56_v10 = vsub.f32 %v44_v9, %v1396_v8  ;;  %p1270_p6 = pnand %p1269_p5, %p1263_p2 }
  0x31   :  { %1108 = vmatmul.mubr.f32.vlgmr.msra.gmra.mrb[0].mxu1 %v56_v10 }
  0x32   :  { %1101 = vmatmul.mubr.f32.vlgmr.msra.gmra.mrb[0].mxu0 %v47_v2  ;;  %1121 = vmatprep.mubr.msk.f32.mxu1 %vm1319_vm0, %v1320_v11 }
  0x33   :  { %1114 = vmatprep.mubr.msk.f32.mxu0 %vm1319_vm0, %v1320_v11 }
 0x104   :  { %v1416_v15 = vpop.f32.mrb[0].mxu1 }
 0x105   :  { %v1102_v12 = vpop.f32.mrb[0].mxu0  ;;  %v1109_v16 = vpop.f32.mrb[1].mxu1 }
 0x106   :  { %v123_v13 = vpop.f32.mrb[1].mxu0 }
 0x107   :  { %v1405_v14 = vpack.c.bf16 %v1102_v12, %v123_v13 }
 0x109   :  { %1175 = vmatpush3.bf16.msra.mxu0 %v1405_v14  ;;  %1178 = vmatpush3.bf16.msra.mxu1 %v1405_v14 }
 0x10a   :  { %1179 = vmatprep.subr.bf16.mxu0 %v1318_v0  ;;  %1182 = vmatprep.subr.bf16.mxu1 %v1318_v0 }
 0x10c   :  { %1115 = vmatmul.mubr.f32.vlgmr.msra.gmra.mrb[2].mxu0 %v1320_v11 }
 0x10d   :  { %1181 = vmatpush3.bf16.msra.mxu0 %v1405_v14  ;;  %1128 = vmatprep.mubr.msk.f32.mxu0 %vm1319_vm0, %v1320_v11 }
 0x10e   :  { %1185 = vmatprep.subr.bf16.mxu0 %v1318_v0 }
 0x1df   :  { %v274_v17 = vpop.f32.mrb[2].mxu0 }
 0x1e0   :  { %v278_v18 = vsub.f32 %v1416_v15, %v274_v17  ;;  %v1116_v19 = vpop.f32.mrb[3].mxu0 }
 0x1e2   :  { %v280_v20 = vsel %vm204_vm1, %v278_v18, -inf }
 0x1e3   :  { %281 = vmax.xlane.f32.xlu0 %v280_v20 }
 0x270   :  { %v282_v22 = vpop.xlane.xlu0 %281 }
 0x271   :  { %vm283_vm2 = vcmp.eq.f32.partialorder %v278_v18, %v282_v22 }
 0x272   :  { %v284_v23 = vsel %vm283_vm2, %v1420_v21, 16 }
 0x273   :  { %v285_v24 = vsel %vm204_vm1, %v284_v23, 2147483647 }
 0x274   :  { %v287_v25 = vshra.s32 %v285_v24, 16  ;;  %v286_v27 = vand.u32 65535, %v285_v24 }
 0x276   :  { %v289_v26 = vcvt.s32.f32 %v287_v25  ;;  %v288_v29 = vcvt.s32.f32 %v286_v27 }
 0x278   :  { %290 = vmin.xlane.f32.xlu0 %v289_v26 }
 0x305   :  { %v291_v28 = vpop.xlane.xlu0 %290 }
 0x306   :  { %vm292_vm3 = vcmp.eq.f32.partialorder %v289_v26, %v291_v28  ;;  %v297_v31 = vcvt.f32.s32 %v291_v28 }
 0x307   :  { %v293_v30 = vsel %vm292_vm3, %v288_v29, inf }
 0x308   :  { %294 = vmin.xlane.f32.xlu1 %v293_v30  ;;  %v298_v33 = vshll.u32 %v297_v31, 16 }
 0x395   :  { %v295_v32 = vpop.xlane.xlu1 %294 }
 0x396   :  { %v296_v34 = vcvt.f32.s32 %v295_v32 }
 0x398   :  { %v299_v35 = vadd.s32 %v298_v33, %v296_v34 }
 0x39a   :  { %vm300_vm4 = vcmp.eq.s32.totalorder %v1420_v21, %v299_v35 }
 0x39b   :  { %v302_v36 = vsel %vm300_vm4, %v278_v18, 0.0 }
 0x39c   :  { %1122 = vmatmul.mubr.msk.f32.vlgmr.msra.gmra.mrb[2].mxu1 %vm204_vm1, %v302_v36  ;;  %v380_v37 = vmul.f32 %v302_v36, %v278_v18 }
 0x39d   :  { %1184 = vmatpush3.bf16.msra.mxu1 %v1405_v14  ;;  %1135 = vmatprep.mubr.msk.f32.mxu1 %vm1319_vm0, %v1320_v11 }
 0x39e   :  { %v381_v38 = vsel %vm204_vm1, %v380_v37, 0.0  ;;  %1188 = vmatprep.subr.bf16.mxu1 %v1318_v0 }
 0x39f   :  { %382 = vadd.xlane.f32.xlu0 %v381_v38 }
 0x42c   :  { %v383_v46 = vpop.xlane.xlu0 %382 }
 0x46f   :  { %v372_v39 = vpop.f32.mrb[2].mxu1 }
 0x470   :  { %v376_v40 = vmul.f32 %v372_v39, %v302_v36  ;;  %v1123_v41 = vpop.f32.mrb[3].mxu1 }
 0x472   :  { %v377_v42 = vsel %vm204_vm1, %v376_v40, 0.0 }
 0x473   :  { %378 = vadd.xlane.f32.xlu1 %v377_v42 }
 0x500   :  { %v379_v43 = vpop.xlane.xlu1 %378 }
 0x501   :  { %v384_v44 = vmax.f32 %v379_v43, 0.001 }
 0x503   :  { %1210 = vrcp.f32 %v384_v44 }
 0x50d   :  { %v1211_v45 = vpop.eup %1210 }
 0x50e   :  { %v386_v47 = vmul.f32 %v1211_v45, %v383_v46 }
 0x510   :  { %v387_v48 = vmul.f32 %v386_v47, %v302_v36 }
 0x512   :  { %v389_v49 = vmax.f32 %v387_v48, 0.0 }
 0x514   :  { %1129 = vmatmul.mubr.msk.f32.vlgmr.msra.gmra.mrb[4].mxu0 %vm204_vm1, %v389_v49  ;;  %vm464_vm7 = vcmp.ne.f32.partialorder %v389_v49, 0.0 }
 0x515   :  { %1187 = vmatpush3.bf16.msra.mxu0 %v1405_v14  ;;  %1142 = vmatprep.mubr.msk.f32.mxu0 %vm1319_vm0, %v1320_v11 }
 0x516   :  { %1191 = vmatprep.subr.bf16.mxu0 %v1318_v0 }
 0x5e7   :  { %v459_v50 = vpop.f32.mrb[4].mxu0 }
 0x5e8   :  { %v463_v51 = vsub.f32 %v1416_v15, %v459_v50  ;;  %v1130_v52 = vpop.f32.mrb[5].mxu0 }
 0x5ea   :  { %v465_v53 = vsel %vm204_vm1, %v463_v51, -inf }
 0x5eb   :  { %466 = vmax.xlane.f32.xlu1 %v465_v53 }
 0x678   :  { %v467_v54 = vpop.xlane.xlu1 %466 }
 0x679   :  { %vm468_vm5 = vcmp.eq.f32.partialorder %v463_v51, %v467_v54 }
 0x67a   :  { %v469_v55 = vsel %vm468_vm5, %v1420_v21, 16 }
 0x67b   :  { %v470_v56 = vsel %vm204_vm1, %v469_v55, 2147483647 }
 0x67c   :  { %v472_v57 = vshra.s32 %v470_v56, 16  ;;  %v471_v59 = vand.u32 65535, %v470_v56 }
 0x67e   :  { %v474_v58 = vcvt.s32.f32 %v472_v57  ;;  %v473_v61 = vcvt.s32.f32 %v471_v59 }
 0x680   :  { %475 = vmin.xlane.f32.xlu0 %v474_v58 }
 0x70d   :  { %v476_v60 = vpop.xlane.xlu0 %475 }
 0x70e   :  { %vm477_vm6 = vcmp.eq.f32.partialorder %v474_v58, %v476_v60  ;;  %v482_v63 = vcvt.f32.s32 %v476_v60 }
 0x70f   :  { %v478_v62 = vsel %vm477_vm6, %v473_v61, inf }
 0x710   :  { %479 = vmin.xlane.f32.xlu1 %v478_v62  ;;  %v483_v2 = vshll.u32 %v482_v63, 16 }
 0x79d   :  { %v480_v1 = vpop.xlane.xlu1 %479 }
 0x79e   :  { %v481_v4 = vcvt.f32.s32 %v480_v1 }
 0x7a0   :  { %v484_v6 = vadd.s32 %v483_v2, %v481_v4 }
 0x7a2   :  { %vm485_vm8 = vcmp.eq.s32.totalorder %v1420_v21, %v484_v6 }
 0x7a3   :  { %vm486_vm9 = vmor %vm464_vm7, %vm485_vm8 }
 0x7a4   :  { %v487_v9 = vsel %vm486_vm9, %v463_v51, 0.0 }
 0x7a5   :  { %1136 = vmatmul.mubr.msk.f32.vlgmr.msra.gmra.mrb[4].mxu1 %vm204_vm1, %v487_v9  ;;  %v565_v10 = vmul.f32 %v487_v9, %v463_v51 }
 0x7a6   :  { %1190 = vmatpush3.bf16.msra.mxu1 %v1405_v14  ;;  %1149 = vmatprep.mubr.msk.f32.mxu1 %vm1319_vm0, %v1320_v11 }
 0x7a7   :  { %v566_v12 = vsel %vm204_vm1, %v565_v10, 0.0  ;;  %1194 = vmatprep.subr.bf16.mxu1 %v1318_v0 }
 0x7a8   :  { %567 = vadd.xlane.f32.xlu1 %v566_v12 }
 0x835   :  { %v568_v23 = vpop.xlane.xlu1 %567 }
 0x878   :  { %v557_v13 = vpop.f32.mrb[4].mxu1 }
 0x879   :  { %v561_v16 = vmul.f32 %v557_v13, %v487_v9  ;;  %v1137_v17 = vpop.f32.mrb[5].mxu1 }
 0x87b   :  { %v562_v18 = vsel %vm204_vm1, %v561_v16, 0.0 }
 0x87c   :  { %563 = vadd.xlane.f32.xlu0 %v562_v18 }
 0x909   :  { %v564_v19 = vpop.xlane.xlu0 %563 }
 0x90a   :  { %v569_v20 = vmax.f32 %v564_v19, 0.001 }
 0x90c   :  { %1212 = vrcp.f32 %v569_v20 }
 0x916   :  { %v1213_v22 = vpop.eup %1212 }
 0x917   :  { %v571_v24 = vmul.f32 %v1213_v22, %v568_v23 }
 0x919   :  { %v572_v25 = vmul.f32 %v571_v24, %v487_v9 }
 0x91b   :  { %v573_v26 = vadd.f32 %v572_v25, %v389_v49 }
 0x91d   :  { %v574_v27 = vmax.f32 %v573_v26, 0.0 }
 0x91f   :  { %1143 = vmatmul.mubr.msk.f32.vlgmr.msra.gmra.mrb[6].mxu0 %vm204_vm1, %v574_v27  ;;  %vm649_vm12 = vcmp.ne.f32.partialorder %v574_v27, 0.0 }
 0x920   :  { %1193 = vmatpush3.bf16.msra.mxu0 %v1405_v14  ;;  %1156 = vmatprep.mubr.msk.f32.mxu0 %vm1319_vm0, %v1320_v11 }
 0x9f2   :  { %v644_v0 = vpop.f32.mrb[6].mxu0 }
 0x9f3   :  { %v648_v28 = vsub.f32 %v1416_v15, %v644_v0  ;;  %v1144_v29 = vpop.f32.mrb[7].mxu0  ;;  %v48_v0 = vld [vmem:[#allocation5 + $0x18] sm:$0xff] }
 0x9f5   :  { %v650_v30 = vsel %vm204_vm1, %v648_v28, -inf }
 0x9f6   :  { %651 = vmax.xlane.f32.xlu0 %v650_v30 }
 0xa83   :  { %v652_v31 = vpop.xlane.xlu0 %651 }
 0xa84   :  { %vm653_vm10 = vcmp.eq.f32.partialorder %v648_v28, %v652_v31 }
 0xa85   :  { %v654_v32 = vsel %vm653_vm10, %v1420_v21, 16 }
 0xa86   :  { %v655_v33 = vsel %vm204_vm1, %v654_v32, 2147483647 }
 0xa87   :  { %v657_v34 = vshra.s32 %v655_v33, 16  ;;  %v656_v36 = vand.u32 65535, %v655_v33 }
 0xa89   :  { %v659_v35 = vcvt.s32.f32 %v657_v34  ;;  %v658_v38 = vcvt.s32.f32 %v656_v36 }
 0xa8b   :  { %660 = vmin.xlane.f32.xlu1 %v659_v35 }
 0xb18   :  { %v661_v37 = vpop.xlane.xlu1 %660 }
 0xb19   :  { %vm662_vm11 = vcmp.eq.f32.partialorder %v659_v35, %v661_v37  ;;  %v667_v40 = vcvt.f32.s32 %v661_v37 }
 0xb1a   :  { %v663_v39 = vsel %vm662_vm11, %v658_v38, inf }
 0xb1b   :  { %664 = vmin.xlane.f32.xlu0 %v663_v39  ;;  %v668_v42 = vshll.u32 %v667_v40, 16 }
 0xba8   :  { %v665_v41 = vpop.xlane.xlu0 %664 }
 0xba9   :  { %v666_v43 = vcvt.f32.s32 %v665_v41 }
 0xbab   :  { %v669_v44 = vadd.s32 %v668_v42, %v666_v43 }
 0xbad   :  { %vm670_vm13 = vcmp.eq.s32.totalorder %v1420_v21, %v669_v44 }
 0xbae   :  { %vm671_vm14 = vmor %vm649_vm12, %vm670_vm13 }
 0xbaf   :  { %v672_v45 = vsel %vm671_vm14, %v648_v28, 0.0 }
 0xbb0   :  { %1150 = vmatmul.mubr.msk.f32.vlgmr.msra.gmra.mrb[6].mxu1 %vm204_vm1, %v672_v45  ;;  %v750_v46 = vmul.f32 %v672_v45, %v648_v28 }
 0xbb1   :  { %1196 = vmatpush3.bf16.msra.mxu1 %v1405_v14  ;;  %1163 = vmatprep.mubr.msk.f32.mxu1 %vm1319_vm0, %v1320_v11 }
 0xbb2   :  { %v751_v47 = vsel %vm204_vm1, %v750_v46, 0.0 }
 0xbb3   :  { %752 = vadd.xlane.f32.xlu0 %v751_v47 }
 0xc40   :  { %v753_v55 = vpop.xlane.xlu0 %752 }
 0xc83   :  { %v742_v48 = vpop.f32.mrb[6].mxu1 }
 0xc84   :  { %v746_v49 = vmul.f32 %v742_v48, %v672_v45  ;;  %v1151_v50 = vpop.f32.mrb[7].mxu1 }
 0xc86   :  { %v747_v51 = vsel %vm204_vm1, %v746_v49, 0.0 }
 0xc87   :  { %748 = vadd.xlane.f32.xlu1 %v747_v51 }
 0xd14   :  { %v749_v52 = vpop.xlane.xlu1 %748 }
 0xd15   :  { %v754_v53 = vmax.f32 %v749_v52, 0.001 }
 0xd17   :  { %1214 = vrcp.f32 %v754_v53 }
 0xd21   :  { %v1215_v54 = vpop.eup %1214 }
 0xd22   :  { %v756_v56 = vmul.f32 %v1215_v54, %v753_v55 }
 0xd24   :  { %v757_v57 = vmul.f32 %v756_v56, %v672_v45 }
 0xd26   :  { %v758_v14 = vadd.f32 %v757_v57, %v574_v27  ;;  %v46_v27 = vld [vmem:[#allocation5 + $0x8] sm:$0xff] }
 0xd27   :  { %v1197_v28 = vpack.c.bf16 %v48_v0, %v46_v27 }
 0xd28   :  { %v759_v58 = vmax.f32 %v758_v14, 0.0 }
 0xd29   :  { %1198 = vmatprep.subr.bf16.mxu0 %v1197_v28 }
 0xd2a   :  { %1157 = vmatmul.mubr.msk.f32.vlgmr.msra.gmra.mrb[8].mxu0 %vm204_vm1, %v759_v58  ;;  %vm834_vm2 = vcmp.ne.f32.partialorder %v759_v58, 0.0 }
 0xd2b   :  { %1018 = vmatprep.mubr.f32.mxu0 %v1320_v11  ;;  %1200 = vmatpush1.bf16.msra.mxu0 %v1380_v3 }
 0xdfd   :  { %v829_v59 = vpop.f32.mrb[8].mxu0 }
 0xdfe   :  { %v833_v60 = vsub.f32 %v1416_v15, %v829_v59  ;;  %v1158_v61 = vpop.f32.mrb[9].mxu0 }
 0xe00   :  { %v835_v62 = vsel %vm204_vm1, %v833_v60, -inf }
 0xe01   :  { %836 = vmax.xlane.f32.xlu1 %v835_v62 }
 0xe8e   :  { %v837_v63 = vpop.xlane.xlu1 %836 }
 0xe8f   :  { %vm838_vm15 = vcmp.eq.f32.partialorder %v833_v60, %v837_v63 }
 0xe90   :  { %v839_v1 = vsel %vm838_vm15, %v1420_v21, 16 }
 0xe91   :  { %v840_v2 = vsel %vm204_vm1, %v839_v1, 2147483647 }
 0xe92   :  { %v842_v4 = vshra.s32 %v840_v2, 16  ;;  %v841_v9 = vand.u32 65535, %v840_v2 }
 0xe94   :  { %v844_v6 = vcvt.s32.f32 %v842_v4  ;;  %v843_v12 = vcvt.s32.f32 %v841_v9 }
 0xe96   :  { %845 = vmin.xlane.f32.xlu0 %v844_v6 }
 0xf23   :  { %v846_v10 = vpop.xlane.xlu0 %845 }
 0xf24   :  { %vm847_vm0 = vcmp.eq.f32.partialorder %v844_v6, %v846_v10  ;;  %v852_v15 = vcvt.f32.s32 %v846_v10 }
 0xf25   :  { %v848_v11 = vsel %vm847_vm0, %v843_v12, inf }
 0xf26   :  { %849 = vmin.xlane.f32.xlu1 %v848_v11  ;;  %v853_v16 = vshll.u32 %v852_v15, 16 }
 0xfb3   :  { %v850_v13 = vpop.xlane.xlu1 %849 }
 0xfb4   :  { %v851_v17 = vcvt.f32.s32 %v850_v13 }
 0xfb6   :  { %v854_v18 = vadd.s32 %v853_v16, %v851_v17 }
 0xfb8   :  { %vm855_vm3 = vcmp.eq.s32.totalorder %v1420_v21, %v854_v18 }
 0xfb9   :  { %vm856_vm4 = vmor %vm834_vm2, %vm855_vm3 }
 0xfba   :  { %v857_v19 = vsel %vm856_vm4, %v833_v60, 0.0 }
 0xfbb   :  { %1164 = vmatmul.mubr.msk.f32.vlgmr.msra.gmra.mrb[8].mxu1 %vm204_vm1, %v857_v19  ;;  %v935_v20 = vmul.f32 %v857_v19, %v833_v60 }
 0xfbd   :  { %v936_v22 = vsel %vm204_vm1, %v935_v20, 0.0 }
 0xfbe   :  { %937 = vadd.xlane.f32.xlu1 %v936_v22 }
0x104b   :  { %v938_v31 = vpop.xlane.xlu1 %937 }
0x108e   :  { %v927_v23 = vpop.f32.mrb[8].mxu1 }
0x108f   :  { %v931_v24 = vmul.f32 %v927_v23, %v857_v19  ;;  %v1165_v25 = vpop.f32.mrb[9].mxu1 }
0x1091   :  { %v932_v26 = vsel %vm204_vm1, %v931_v24, 0.0 }
0x1092   :  { %933 = vadd.xlane.f32.xlu0 %v932_v26 }
0x111f   :  { %v934_v21 = vpop.xlane.xlu0 %933 }
0x1120   :  { %v939_v29 = vmax.f32 %v934_v21, 0.001 }
0x1122   :  { %1216 = vrcp.f32 %v939_v29 }
0x112c   :  { %v1217_v30 = vpop.eup %1216 }
0x112d   :  { %v941_v32 = vmul.f32 %v1217_v30, %v938_v31 }
0x112f   :  { %v942_v33 = vmul.f32 %v941_v32, %v857_v19 }
0x1131   :  { %v943_v34 = vadd.f32 %v942_v33, %v759_v58 }
0x1133   :  { %v944_v35 = vmax.f32 %v943_v34, 0.0 }
0x1135   :  { %1064 = vmatmul.mubr.msk.f32.vlgmr.msra.gmra.mrb[10].mxu0 %vm204_vm1, %v944_v35  ;;  %945 = vst.msk [vmem:[#allocation7] sm:$0xff] %vm204_vm1, %v944_v35 }
0x1136   :  { %1273 = shalt.err (!%p1270_p6)
}
0x1137   :  { %s1274_s19 = scalar_lea.hbm %s1507_s3, 128 }
0x1138   :  { %p1275_p7 = scmp.ne.s32.totalorder %s1507_s3, %s1274_s19  ;;  %p1278_p8 = scmp.lt.u32.totalorder %s1274_s19, %s1507_s3 }
0x113a   :  { %p1280_p9 = pnand %p1278_p8, %p1275_p7 }
0x113c   :  { %1283 = shalt.err (!%p1280_p9)
}
0x113d   :  { %1036 = dma.vmem_to_hbm [thread:$0]  %s1034_s15, 128, %s1507_s3, [#allocation4]   ;;  %v948_v3 = vsub.s32 1, %v1387_v5 }
0x113e   :  { %s1322_s26 = smov [#allocation8]  }
0x113f   :  { %v949_v36 = vrot.slane %v1393_v7, %v948_v3  ;;  %s1043_s27 = sshll.u32 %s1322_s26, 4  ;;  %s1044_s27 = int_to_ptr.vmem [resolvable:$true] %s1043_s27 }
0x1140   :  { %s1284_s28 = scalar_lea.vmem %s1044_s27, 256  ;;  %p1289_p11 = scmp.lt.s32.totalorder %s1044_s27, %s1044_s27 }
0x1141   :  { %p1285_p10 = scmp.ne.s32.totalorder %s1044_s27, %s1284_s28  ;;  %p1290_p12 = scmp.lt.s32.totalorder %s1284_s28, %s1284_s28 }
0x1143   :  { %p1291_p13 = por %p1290_p12, %p1289_p11 }
0x1145   :  { %p1292_p0 = pnand %p1291_p13, %p1285_p10 }
0x1208   :  { %v1020_v37 = vpop.f32.mrb[10].mxu0 }
0x1209   :  { %v1021_v38 = vadd.f32 %v1020_v37, %v1396_v8  ;;  %v1022_v39 = vpop.f32.mrb[11].mxu0 }
0x120a   :  { %v1023_v40 = vadd.f32 %v1022_v39, %v949_v36 }
0x120b   :  { %1025 = vst [vmem:[#allocation8] sm:$0xff] %v1021_v38 }
0x120c   :  { %1026 = vst [vmem:[#allocation8 + $0x8] sm:$0xff] %v1023_v40 }
0x120d   :  { %1295 = shalt.err (!%p1292_p0)
}
0x120e   :  { %s1296_s30 = scalar_lea.hbm %s1508_s4, 256 }
0x120f   :  { %p1297_p1 = scmp.ne.s32.totalorder %s1508_s4, %s1296_s30  ;;  %p1300_p2 = scmp.lt.u32.totalorder %s1296_s30, %s1508_s4 }
0x1211   :  { %p1302_p3 = pnand %p1300_p2, %p1297_p1 }
0x1213   :  { %1305 = shalt.err (!%p1302_p3)
}
0x1214   :  { %1046 = dma.vmem_to_hbm [thread:$0]  %s1044_s27, 256, %s1508_s4, [#allocation9]  }
0x1215   :  { %1310 = dma.done.wait [#allocation4], 128  }
0x1216   :  { %1311 = vsyncadd [#allocation4], 4294967168 }
0x1217   :  { %1312 = dma.done.wait [#allocation9], 256  }
0x1218   :  { %1313 = vsyncadd [#allocation9], 4294967040 }
0x1219   :  { %1053 = vsyncpa [#allocation3], 1 }
0x121a   :  { %1054 = vsyncpa [#allocation6], 1 }
0x121b   :  { %1055 = vsyncpa [#allocation4], 1 }
0x121c   :  { %1056 = vsyncpa [#allocation9], 1 }

</bundles_post_ra>
